<compile_context>
chip_gen: v6e
topology: v6e:2x2x1
jax: 0.10.0
libtpu: 0.0.40
codegen_flags: <defaults>
</compile_context>

<pallas_src>
import functools

import jax
import jax.numpy as jnp
from jax.experimental import pallas as pl
from jax.experimental.pallas import tpu as pltpu


# ----------------------------------------------------------------------------
# PE table construction (deterministic buffer, equivalent to __init__)
# ----------------------------------------------------------------------------
def build_positional_encoding(length: int, d_model: int) -> jnp.ndarray:
    position = jnp.arange(0, length, dtype=jnp.float32)[:, None]            # (L, 1)
    if d_model % 2 == 1:
        denom = jnp.power(
            10000.0,
            (2.0 * jnp.arange(d_model // 2 + 1, dtype=jnp.float32)) / d_model,
        )[None, :]
        sin_den, cos_den = denom, denom[:, :-1]
    else:
        denom = jnp.power(
            10000.0,
            (2.0 * jnp.arange(d_model // 2, dtype=jnp.float32)) / d_model,
        )[None, :]
        sin_den, cos_den = denom, denom
    pe = jnp.zeros((length, d_model), dtype=jnp.float32)
    pe = pe.at[:, 0::2].set(jnp.sin(position / sin_den))
    pe = pe.at[:, 1::2].set(jnp.cos(position / cos_den))
    return pe[None, :, :]                                                    # (1, L, d_model)


# ----------------------------------------------------------------------------
# Pallas kernel: y = dropout(x + pe)   on a (B, S*D) lane-dense view
# ----------------------------------------------------------------------------
def _pe_dropout_kernel(seed_ref, x_ref, pe_ref, o_ref, *,
                       p: float, training: bool, keep_scale: float,
                       n_per_batch: int, tile_n: int):
    # x_ref: (B, TN) tile; pe_ref: (1, TN) tile shared across all batch rows (broadcast add)
    y = x_ref[...] + pe_ref[...]
    if training and p > 0.0:
        bsz, tn = x_ref.shape
        # Stateless counter-based hash PRNG (splitmix32-style).  Mask depends only on
        # (seed, global element id) -> independent of tiling, every grid step independent,
        # so the grid can stay "parallel" (megacore-shardable).
        seed = seed_ref[0].astype(jnp.uint32) * jnp.uint32(0x9E3779B9)
        step = pl.program_id(0).astype(jnp.uint32)
        row = jax.lax.broadcasted_iota(jnp.int32, (bsz, tn), 0).astype(jnp.uint32)
        col = jax.lax.broadcasted_iota(jnp.int32, (bsz, tn), 1).astype(jnp.uint32)
        idx = row * jnp.uint32(n_per_batch) + step * jnp.uint32(tile_n) + col
        h = idx + seed
        h = h ^ (h >> 16)
        h = h * jnp.uint32(0x7FEB352D)
        h = h ^ (h >> 15)
        h = h * jnp.uint32(0x846CA68B)
        h = h ^ (h >> 16)
        # integer-domain threshold test + single select folding the 1/(1-p) scale (VALU-lean)
        threshold = jnp.uint32(int(p * float(1 << 24)))
        keep = (h >> 8) >= threshold
        y = y * jnp.where(keep, jnp.float32(keep_scale), jnp.float32(0.0))
    o_ref[...] = y


def _pick_tile_n(n: int, b: int, itemsize: int = 4,
                 vmem_budget_bytes: int = 8 * 1024 * 1024) -> int:
    """Largest multiple-of-128 divisor of n whose double-buffered footprint
    (x + out: b rows each, pe: 1 row) stays within the VMEM budget (safe on v5e/v6e/v7x)."""
    if n % 128 != 0 or n <= 128:
        return n                     # fall back to a single full block (block == full array dims)
    max_tn = vmem_budget_bytes // (2 * (2 * b + 1) * itemsize)
    tn = max((max_tn // 128) * 128, 128)
    tn = min(tn, n)
    while n % tn != 0:
        tn -= 128
    return tn


def positional_encoding_forward(x, pe, seed, *, p=0.1, training=False):
    """x: (B, S, D) f32; pe: (1, L, D) f32 with L >= S; seed: python int / int32 scalar."""
    B, S, D = x.shape
    N = S * D
    x2 = x.reshape(B, N)                      # lane-dense view: last dim is S*D
    pe2 = pe[:, :S, :].reshape(1, N)          # slice in wrapper (avoids (8,128) trap vs (1, L, D))
    tn = _pick_tile_n(N, B)
    grid = (N // tn,)

    kernel = functools.partial(
        _pe_dropout_kernel,
        p=float(p), training=bool(training),
        keep_scale=(1.0 / (1.0 - float(p))) if float(p) < 1.0 else 0.0,
        n_per_batch=N, tile_n=tn)

    out = pl.pallas_call(
        kernel,
        out_shape=jax.ShapeDtypeStruct((B, N), jnp.float32),
        grid_spec=pltpu.PrefetchScalarGridSpec(
            num_scalar_prefetch=1,                                 # seed lands in SMEM
            grid=grid,
            in_specs=[
                pl.BlockSpec((B, tn), lambda n, seed: (0, n)),     # x tile (all batch rows)
                pl.BlockSpec((1, tn), lambda n, seed: (0, n)),     # pe tile, fetched once per step
            ],
            out_specs=pl.BlockSpec((B, tn), lambda n, seed: (0, n)),
        ),
        compiler_params=pltpu.CompilerParams(
            dimension_semantics=("parallel",),                     # independent steps
            vmem_limit_bytes=32 * 1024 * 1024,                     # explicit headroom, fits v7x too
        ),
    )(jnp.asarray([seed], dtype=jnp.int32), x2, pe2)
    return out.reshape(B, S, D)


# ----------------------------------------------------------------------------
# Demo / correctness check
# ----------------------------------------------------------------------------
if __name__ == "__main__":
    B, S, D = 2, 8, 32
    LENGTH = 64           # buffer longer than seq, as in the module (5000 there)
    P_DROP = 0.1

    key = jax.random.PRNGKey(0)
    x = jax.random.normal(key, (B, S, D), dtype=jnp.float32)
    pe = build_positional_encoding(LENGTH, D)
    ref = x + pe[:, :S, :]

    # eval mode: dropout is identity -> must match reference
    y_eval = jax.block_until_ready(
        positional_encoding_forward(x, pe, seed=0, p=P_DROP, training=False))
    assert y_eval.shape == (B, S, D)
    assert jnp.allclose(y_eval, ref, atol=1e-6), "eval-mode mismatch vs reference"

    # train mode: every element is either exactly 0 (dropped) or (x+pe)/(1-p) (kept & rescaled)
    y_train = jax.block_until_ready(
        positional_encoding_forward(x, pe, seed=1234, p=P_DROP, training=True))
    assert y_train.shape == (B, S, D)
    scaled = ref / (1.0 - P_DROP)
    is_zero = jnp.isclose(y_train, 0.0, atol=1e-6)
    is_kept = jnp.isclose(y_train, scaled, atol=1e-5, rtol=1e-5)
    assert bool(jnp.all(is_zero | is_kept)), "train-mode elements not in {0, (x+pe)/(1-p)}"
    drop_rate = float(jnp.mean(is_zero & ~jnp.isclose(scaled, 0.0, atol=1e-6)))
    assert 0.0 < drop_rate < 0.35, f"implausible drop rate {drop_rate}"

    print("KERNEL_OK")
</pallas_src>

<mosaic_0001>
module attributes {stable_mosaic.version = 11 : i64} {
  func.func @_pe_dropout_kernel(%arg0: i32, %arg1: memref<1xi32, #tpu.memory_space<smem>>, %arg2: memref<2x256xf32, #tpu.memory_space<vmem>>, %arg3: memref<1x256xf32, #tpu.memory_space<vmem>>, %arg4: memref<2x256xf32, #tpu.memory_space<vmem>>) attributes {dimension_semantics = [#tpu.dimension_semantics<parallel>], iteration_bounds = array<i64: 1>, scalar_prefetch = 1 : i64, scratch_operands = 0 : i64, tpu.core_type = #tpu.core_type<tc>, window_params = [{transform_indices = @transform_0, window_bounds = array<i64: 2, 256>}, {transform_indices = @transform_1, window_bounds = array<i64: 1, 256>}, {transform_indices = @transform_2, window_bounds = array<i64: 2, 256>}]} {
    %c0 = arith.constant 0 : index
    %c0_0 = arith.constant 0 : index
    %0 = vector.load %arg2[%c0, %c0_0] : memref<2x256xf32, #tpu.memory_space<vmem>>, vector<2x256xf32>
    %c0_1 = arith.constant 0 : index
    %c0_2 = arith.constant 0 : index
    %1 = vector.load %arg3[%c0_1, %c0_2] : memref<1x256xf32, #tpu.memory_space<vmem>>, vector<1x256xf32>
    %2 = vector.broadcast %1 : vector<1x256xf32> to vector<2x256xf32>
    %3 = arith.addf %0, %2 : vector<2x256xf32>
    %c0_3 = arith.constant 0 : index
    %c0_4 = arith.constant 0 : index
    %4 = vector.load %arg4[%c0_3, %c0_4] : memref<2x256xf32, #tpu.memory_space<vmem>>, vector<2x256xf32>
    tpu.vector_store %arg4[%c0_3, %c0_4], %3 {strides = array<i32>} : memref<2x256xf32, #tpu.memory_space<vmem>>, vector<2x256xf32>,
    return
  }
  func.func @transform_0(%arg0: i32, %arg1: memref<1xi32, #tpu.memory_space<smem>>) -> (i32, i32) {
    %c0_i32 = arith.constant 0 : i32
    %c0_i32_0 = arith.constant 0 : i32
    return %c0_i32, %arg0 : i32, i32
  }
  func.func @transform_1(%arg0: i32, %arg1: memref<1xi32, #tpu.memory_space<smem>>) -> (i32, i32) {
    %c0_i32 = arith.constant 0 : i32
    %c0_i32_0 = arith.constant 0 : i32
    return %c0_i32, %arg0 : i32, i32
  }
  func.func @transform_2(%arg0: i32, %arg1: memref<1xi32, #tpu.memory_space<smem>>) -> (i32, i32) {
    %c0_i32 = arith.constant 0 : i32
    %c0_i32_0 = arith.constant 0 : i32
    return %c0_i32, %arg0 : i32, i32
  }
}

</mosaic_0001>

<bundles_post_ra>
// kernel: tpu_custom_call.1
= control target key start
LH: loop header
LB: loop body
LE: loop exit
PB: predicated region body
PF: predicated region fallthrough
CT: control target
= control target key end

     0   :  { %9 = vsyncpa [#allocation5], 0  ;;  %s142_s0 = inlined_call_operand.<no memory space> [shape: s32[1], index: 0, kind: input, shape index: {}]   ;;  %s143_s1 = inlined_call_operand.hbm [shape: f32[2,256], index: 1, kind: input, shape index: {}]   ;;  %s144_s2 = inlined_call_operand.vmem [shape: f32[1,256], index: 2, kind: input, shape index: {}]   ;;  %s145_s3 = inlined_call_operand.hbm [shape: f32[2,256], index: 3, kind: output, shape index: {}]  }
   0x1   :  { %10 = vsyncpa [#allocation6], 0  ;;  %s110_s12 = smov [#allocation4]  }
   0x2   :  { %s17_s13 = sshll.u32 %s110_s12, 4  ;;  %s18_s13 = int_to_ptr.vmem [resolvable:$true] %s17_s13 }
   0x3   :  { %s74_s14 = scalar_lea.vmem %s18_s13, 64  ;;  %p79_p1 = scmp.lt.s32.totalorder %s18_s13, %s18_s13 }
   0x4   :  { %p75_p0 = scmp.ne.s32.totalorder %s18_s13, %s74_s14  ;;  %p80_p2 = scmp.lt.s32.totalorder %s74_s14, %s74_s14 }
   0x6   :  { %p81_p3 = por %p80_p2, %p79_p1 }
   0x8   :  { %p82_p4 = pnand %p81_p3, %p75_p0 }
   0xa   :  { %85 = shalt.err (!%p82_p4)
}
   0xb   :  { %20 = dma.hbm_to_vmem [thread:$0]  %s143_s1, 64, %s18_s13, [#allocation5]  }
   0xc   :  { %106 = dma.done.wait [#allocation5], 64  }
   0xd   :  { %107 = vsyncadd [#allocation5], 4294967232  ;;  %v29_v0 = vlaneseq  ;;  %v111_v1 = vmov 1983009808   ;;  %v27_v7 = vld [vmem:[%s144_s2] sm:$0x3] }
   0xe   :  { %v39_v2 = vunpack.c.l.s4 %v111_v1  ;;  %v26_v12 = vld [vmem:[#allocation4] sm:$0xf]  ;;  %s112_s18 = smov [#allocation7]  }
   0xf   :  { %v30_v3 = vshrl.u32 %v29_v0, 7  ;;  %s54_s1 = sshll.u32 %s112_s18, 4  ;;  %s55_s1 = int_to_ptr.vmem [resolvable:$true] %s54_s1 }
  0x10   :  { %v40_v6 = vunpack.c.0.s8 %v39_v2  ;;  %s86_s19 = scalar_lea.vmem %s55_s1, 64  ;;  %p91_p6 = scmp.lt.s32.totalorder %s55_s1, %s55_s1 }
  0x11   :  { %v31_v4 = vsub.s32 0, %v30_v3  ;;  %v35_v5 = vsub.s32 1, %v30_v3  ;;  %p87_p5 = scmp.ne.s32.totalorder %s55_s1, %s86_s19  ;;  %p92_p7 = scmp.lt.s32.totalorder %s86_s19, %s86_s19 }
  0x12   :  { %v43_v10 = vsub.s32 %v40_v6, %v30_v3 }
  0x13   :  { %v32_v8 = vrot.slane %v27_v7, %v31_v4  ;;  %v36_v9 = vrot.slane %v27_v7, %v35_v5  ;;  %p93_p8 = por %p92_p7, %p91_p6 }
  0x15   :  { %v37_v11 = vcombine.low %v32_v8, %v36_v9  ;;  %p94_p9 = pnand %p93_p8, %p87_p5 }
  0x17   :  { %v44_v13 = vrot.slane %v37_v11, %v43_v10 }
  0x19   :  { %v46_v14 = vadd.f32 %v44_v13, %v26_v12 }
  0x1b   :  { %47 = vst [vmem:[#allocation7] sm:$0xf] %v46_v14 }
  0x1c   :  { %97 = shalt.err (!%p94_p9)
}
  0x1d   :  { %57 = dma.vmem_to_hbm [thread:$0]  %s55_s1, 64, %s145_s3, [#allocation6]  }
  0x1e   :  { %108 = dma.done.wait [#allocation6], 64  }
  0x1f   :  { %109 = vsyncadd [#allocation6], 4294967232 }
  0x20   :  { %61 = vsyncpa [#allocation5], 1 }
  0x21   :  { %62 = vsyncpa [#allocation6], 1 }

</bundles_post_ra>
